<compile_context>
chip_gen: v7x
topology: tpu7x:2x2x1
jax: 0.10.0
libtpu: 0.0.40
codegen_flags: <defaults>
</compile_context>

<pallas_src>
import math

import jax
import jax.numpy as jnp
from jax.experimental import pallas as pl
from jax.experimental.pallas import tpu as pltpu

_LANE = 128


def _identity_block_kernel(x_ref, o_ref):
    # Pure pass-through: the whole "forward" of DeconvNet is a no-op.
    o_ref[...] = x_ref[...]


def _identity_dma_kernel(x_hbm_ref, o_hbm_ref, sem):
    # Whole-array HBM -> HBM copy via one DMA (no VMEM staging, no layout
    # constraints) for element counts that are not lane (128) friendly.
    cp = pltpu.make_async_copy(x_hbm_ref, o_hbm_ref, sem)
    cp.start()
    cp.wait()


def _device_tuning():
    """Returns (tile_bytes_budget, vmem_limit_bytes) for the local TPU gen."""
    try:
        kind = jax.devices()[0].device_kind.lower()
    except Exception:  # pragma: no cover - defensive; fall back to safe values
        kind = ""
    if "v7" in kind:
        # v7x: ~3.2 TB/s HBM makes per-step overhead visible -> 8 MiB tiles,
        # but only 64 MiB physical VMEM -> cap scoped VMEM at 48 MiB.
        return 8 << 20, 48 << 20
    # v5e / v6e: 4 MiB tiles sit at the measured roofline knee; 32 MiB scoped
    # VMEM covers in+out double buffering on every generation.
    return 4 << 20, 32 << 20


def deconvnet_forward(x: jax.Array, *, alias_input_output: bool = False) -> jax.Array:
    """Pallas 'forward' for DeconvNet.

    The PyTorch forward returns None; here the input is returned unchanged
    (identity), routed through a Pallas TPU kernel so the on-device data path
    is exercised.  Set ``alias_input_output=True`` only if the caller donates
    ``x`` (e.g. ``jax.jit(..., donate_argnums=0)``); otherwise aliasing makes
    XLA insert a defensive copy and costs an extra HBM pass.
    """
    orig_shape = x.shape
    dtype = x.dtype
    total = math.prod(orig_shape)
    if total == 0:
        return x

    itemsize = jnp.dtype(dtype).itemsize
    slab_bytes = total * itemsize
    cost = pl.CostEstimate(flops=0, transcendentals=0, bytes_accessed=2 * slab_bytes)
    io_alias = {0: 0} if alias_input_output else {}

    if total % _LANE != 0:
        # Lane-unfriendly element count: one whole-array HBM->HBM DMA. Exactly
        # one HBM read + one HBM write; no pad / slice round trips, any shape.
        # (No aliasing here: src == dst would make the DMA copy onto itself.)
        return pl.pallas_call(
            _identity_dma_kernel,
            out_shape=jax.ShapeDtypeStruct(orig_shape, dtype),
            in_specs=[pl.BlockSpec(memory_space=pl.ANY)],
            out_specs=pl.BlockSpec(memory_space=pl.ANY),
            scratch_shapes=[pltpu.SemaphoreType.DMA],
            cost_estimate=cost,
        )(x)

    # Lane-dense 2D slab: widest column width in {1024, 512, 256, 128} that
    # divides the element count exactly -> no lane padding, unmasked vst.
    cols = _LANE
    for cand in (1024, 512, 256, 128):
        if total % cand == 0:
            cols = cand
            break
    rows = total // cols
    x2d = x.reshape(rows, cols)
    row_bytes = cols * itemsize

    # Packed sublane multiple for this dtype (8 for 4-byte, 16 for 2-byte,
    # 32 for 1-byte) keeps block-edge loads/stores full-width.
    sublane = max(8, 32 // itemsize)

    tile_budget, vmem_limit = _device_tuning()

    # Aim for >=4 pipeline steps once the slab exceeds ~256 KiB so the input
    # and output DMA streams overlap; cap per-tile bytes at the generation
    # budget (double-buffered in+out = 4 x tile stays under scoped VMEM).
    if slab_bytes <= (256 << 10):
        tile_r = rows
    else:
        tgt_bytes = min(tile_budget, max(256 << 10, slab_bytes // 4))
        tile_r = max(sublane, (tgt_bytes // row_bytes) // sublane * sublane)
        if tile_r >= rows:
            tile_r = rows

    if tile_r == rows:
        # Single whole-array block: no grid, no per-step overhead.
        out2d = pl.pallas_call(
            _identity_block_kernel,
            out_shape=jax.ShapeDtypeStruct((rows, cols), dtype),
            cost_estimate=cost,
            input_output_aliases=io_alias,
        )(x2d)
    else:
        # Row-tiled, double-buffered pipelined copy.  cdiv grid: the ragged
        # last block (rows not a multiple of tile_r) is handled by Pallas
        # boundary masking -- no jnp.pad and no trailing slice.
        grid = (pl.cdiv(rows, tile_r),)
        out2d = pl.pallas_call(
            _identity_block_kernel,
            out_shape=jax.ShapeDtypeStruct((rows, cols), dtype),
            grid=grid,
            in_specs=[pl.BlockSpec((tile_r, cols), lambda i: (i, 0))],
            out_specs=pl.BlockSpec((tile_r, cols), lambda i: (i, 0)),
            compiler_params=pltpu.CompilerParams(
                # "parallel" is neutral on single-TC v5e/v6e but shards the
                # row grid across v7x's two TensorCores.
                dimension_semantics=("parallel",),
                vmem_limit_bytes=vmem_limit,
            ),
            cost_estimate=cost,
            input_output_aliases=io_alias,
        )(x2d)

    return out2d.reshape(orig_shape)


if __name__ == "__main__":
    key = jax.random.PRNGKey(0)
    k1, k2 = jax.random.split(key)

    # Small NCHW input consistent with an image-style network.
    x = jax.random.normal(k1, (2, 4, 16, 16), dtype=jnp.float32)
    y = jax.block_until_ready(deconvnet_forward(x))
    assert y.shape == x.shape and y.dtype == x.dtype
    assert bool(jnp.array_equal(y, x)), "identity pass-through mismatch (single block)"

    # Second input exercises the multi-step cdiv grid with a ragged last
    # block (72 rows x 1024 lanes -> two 64-row blocks, boundary-masked).
    x2 = jax.random.normal(k2, (2, 4, 96, 96), dtype=jnp.float32)
    y2 = jax.block_until_ready(deconvnet_forward(x2))
    assert y2.shape == x2.shape and y2.dtype == x2.dtype
    assert bool(jnp.array_equal(y2, x2)), "identity pass-through mismatch (tiled path)"

    print("KERNEL_OK")
</pallas_src>

<mosaic_0001>
module attributes {stable_mosaic.version = 11 : i64} {
  func.func @_identity_block_kernel(%arg0: memref<2x1024xf32, #tpu.memory_space<vmem>>, %arg1: memref<2x1024xf32, #tpu.memory_space<vmem>>) attributes {dimension_semantics = [], scalar_prefetch = 0 : i64, scratch_operands = 0 : i64, tpu.core_type = #tpu.core_type<tc>} {
    %c0 = arith.constant 0 : index
    %c0_0 = arith.constant 0 : index
    %0 = vector.load %arg0[%c0, %c0_0] : memref<2x1024xf32, #tpu.memory_space<vmem>>, vector<2x1024xf32>
    %c0_1 = arith.constant 0 : index
    %c0_2 = arith.constant 0 : index
    %1 = vector.load %arg1[%c0_1, %c0_2] : memref<2x1024xf32, #tpu.memory_space<vmem>>, vector<2x1024xf32>
    tpu.vector_store %arg1[%c0_1, %c0_2], %0 {strides = array<i32>} : memref<2x1024xf32, #tpu.memory_space<vmem>>, vector<2x1024xf32>,
    return
  }
}

</mosaic_0001>

<bundles_post_ra>
// kernel: tpu_custom_call.1
= control target key start
LH: loop header
LB: loop body
LE: loop exit
PB: predicated region body
PF: predicated region fallthrough
CT: control target
= control target key end

     0   :  { %6 = vsyncpa [#allocation3], 0  ;;  %s126_s0 = inlined_call_operand.hbm [shape: f32[2,1024], index: 0, kind: input, shape index: {}]   ;;  %s127_s1 = inlined_call_operand.hbm [shape: f32[2,1024], index: 1, kind: output, shape index: {}]  }
   0x1   :  { %7 = vsyncpa [#allocation4], 0  ;;  %s90_s6 = smov [#allocation2]   ;;  %s42_s10 = scalar_lea.hbm %s126_s0, 256 }
   0x2   :  { %s14_s7 = sshll.u32 %s90_s6, 4  ;;  %p43_p0 = scmp.ne.s32.totalorder %s126_s0, %s42_s10  ;;  %s15_s7 = int_to_ptr.vmem [resolvable:$true] %s14_s7 }
   0x3   :  { %p46_p1 = scmp.lt.u32.totalorder %s42_s10, %s126_s0 }
   0x5   :  { %p48_p2 = pnand %p46_p1, %p43_p0 }
   0x7   :  { %51 = shalt.err (!%p48_p2)
}
   0x8   :  { %s52_s15 = scalar_lea.vmem %s15_s7, 256  ;;  %p57_p4 = scmp.lt.s32.totalorder %s15_s7, %s15_s7 }
   0x9   :  { %p53_p3 = scmp.ne.s32.totalorder %s15_s7, %s52_s15  ;;  %p58_p5 = scmp.lt.s32.totalorder %s52_s15, %s52_s15 }
   0xb   :  { %p59_p6 = por %p58_p5, %p57_p4 }
   0xd   :  { %p60_p7 = pnand %p59_p6, %p53_p3 }
   0xf   :  { %63 = shalt.err (!%p60_p7)
}
  0x10   :  { %17 = dma.hbm_to_vmem [thread:$0]  %s126_s0, 256, %s15_s7, [#allocation3]  }
  0x11   :  { %86 = dma.done.wait [#allocation3], 256  }
  0x12   :  { %87 = vsyncadd [#allocation3], 4294967040  ;;  %s91_s18 = smov [#allocation5]   ;;  %v21_v0 = vld [vmem:[#allocation2] sm:$0xff]  ;;  %v22_v1 = vld [vmem:[#allocation2 + $0x8] sm:$0xff] }
  0x13   :  { %s31_s19 = sshll.u32 %s91_s18, 4  ;;  %23 = vst [vmem:[#allocation5] sm:$0xff] %v21_v0  ;;  %24 = vst [vmem:[#allocation5 + $0x8] sm:$0xff] %v22_v1  ;;  %s32_s19 = int_to_ptr.vmem [resolvable:$true] %s31_s19 }
  0x14   :  { %s64_s20 = scalar_lea.vmem %s32_s19, 256  ;;  %p69_p9 = scmp.lt.s32.totalorder %s32_s19, %s32_s19 }
  0x15   :  { %p65_p8 = scmp.ne.s32.totalorder %s32_s19, %s64_s20  ;;  %p70_p10 = scmp.lt.s32.totalorder %s64_s20, %s64_s20 }
  0x17   :  { %p71_p11 = por %p70_p10, %p69_p9 }
  0x19   :  { %p72_p12 = pnand %p71_p11, %p65_p8 }
  0x1b   :  { %75 = shalt.err (!%p72_p12)
}
  0x1c   :  { %s76_s0 = scalar_lea.hbm %s127_s1, 256 }
  0x1d   :  { %p77_p13 = scmp.ne.s32.totalorder %s127_s1, %s76_s0  ;;  %p80_p0 = scmp.lt.u32.totalorder %s76_s0, %s127_s1 }
  0x1f   :  { %p82_p1 = pnand %p80_p0, %p77_p13 }
  0x21   :  { %85 = shalt.err (!%p82_p1)
}
  0x22   :  { %34 = dma.vmem_to_hbm [thread:$0]  %s32_s19, 256, %s127_s1, [#allocation4]  }
  0x23   :  { %88 = dma.done.wait [#allocation4], 256  }
  0x24   :  { %89 = vsyncadd [#allocation4], 4294967040 }
  0x25   :  { %38 = vsyncpa [#allocation3], 1 }
  0x26   :  { %39 = vsyncpa [#allocation4], 1 }

</bundles_post_ra>
